<compile_context>
chip_gen: v5e
topology: v5e:2x2
jax: 0.10.0
libtpu: 0.0.40
codegen_flags: <defaults>
</compile_context>

<pallas_src>
import functools

import jax
import jax.numpy as jnp
from jax.experimental import pallas as pl
from jax.experimental.pallas import tpu as pltpu


def dnn_kernel(x_ref, w1_ref, b1_ref, w2_ref, b2_ref, w3_ref, b3_ref, o_ref):
    def sigmoid(z):
        # exp (EUP) + approx reciprocal (EUP): keeps the activation off the VPU
        # divide sequence; both issue in the otherwise-idle EUP slot.
        return pl.reciprocal(1.0 + jnp.exp(-z), approx=True)

    # Layer 1: [tile, in] @ [in, h1]  (bf16 operands, f32 accumulate on the MXU)
    h1 = jnp.dot(x_ref[...], w1_ref[...], preferred_element_type=jnp.float32)
    h1 = sigmoid(h1 + b1_ref[...])                               # f32 bias + EUP sigmoid

    # Layer 2: [tile, h1] @ [h1, h2]
    h2 = jnp.dot(h1.astype(w2_ref.dtype), w2_ref[...],
                 preferred_element_type=jnp.float32)
    h2 = sigmoid(h2 + b2_ref[...])                               # f32

    # Layer 3 (lane-dense, no transpose): contract last dims of [1, h2] and
    # [tile, h2] -> [1, tile].  bf16 operands, f32 accumulate.
    out_row = jax.lax.dot_general(
        w3_ref[...], h2.astype(w3_ref.dtype),
        dimension_numbers=(((1,), (1,)), ((), ())),
        preferred_element_type=jnp.float32)
    out_row = out_row + b3_ref[0, 0]                             # scalar bias from SMEM
    o_ref[0] = out_row.astype(o_ref.dtype)                       # unmasked lane-dense store


def _round_up(a: int, m: int) -> int:
    return ((a + m - 1) // m) * m


def _num_tensorcores() -> int:
    """Best-effort TensorCores-per-chip query (v7x/megacore=2, v5e/v6e=1)."""
    try:
        info = pltpu.get_tpu_info()
        for attr in ("num_cores", "tensorcores_per_chip", "num_tensorcores"):
            v = getattr(info, attr, None)
            if v:
                return max(1, int(v))
    except Exception:
        pass
    try:
        return max(1, int(getattr(jax.devices()[0], "num_cores", 1)))
    except Exception:
        return 1


@functools.partial(jax.jit, static_argnames=("tile_m", "num_tcs", "use_bf16"))
def _dnn_forward(x, params, *, tile_m, num_tcs, use_bf16):
    w1, b1, w2, b2, w3, b3 = params
    n, input_dim = x.shape
    first_hidden = w1.shape[1]
    second_hidden = w2.shape[1]

    # --- balanced batch-tile selection ---------------------------------------
    # Big tiles amortize per-grid-step overhead and fill the MXU's M dimension
    # (K/N are fixed by the tiny hidden dims).  Balance tiles against N so
    # zero-padding is <128 rows per tile rather than up to tile-128.
    n_pad128 = _round_up(n, 128)
    tile_req = max(_round_up(tile_m, 128), 128)
    num_tiles = pl.cdiv(n_pad128, tile_req)
    num_tiles = max(1, min(num_tiles, n_pad128 // 128))      # never an all-padding tile
    if num_tcs > 1 and n_pad128 >= num_tcs * 128:
        # Feed every TensorCore on multi-TC chips (v7x); single-TC v5e/v6e keep
        # the minimal step count (extra steps there are pure serial overhead).
        num_tiles = _round_up(num_tiles, num_tcs)
    tile = _round_up(pl.cdiv(n_pad128, num_tiles), 128)
    n_pad = num_tiles * tile

    # --- dtype / layout plumbing ----------------------------------------------
    in_dtype = jnp.bfloat16 if use_bf16 else jnp.float32
    x_p = x if n_pad == n else jnp.pad(x, ((0, n_pad - n), (0, 0)))
    x_p = x_p.astype(in_dtype)                                   # halves dominant HBM stream
    w1_c = w1.astype(in_dtype)
    w2_c = w2.astype(in_dtype)
    w3_row = w3.astype(in_dtype).reshape(1, second_hidden)       # bf16 like layers 1-2
    b1_c = b1.astype(jnp.float32).reshape(1, first_hidden)
    b2_c = b2.astype(jnp.float32).reshape(1, second_hidden)
    b3_c = b3.astype(jnp.float32).reshape(1, 1)                  # scalar -> SMEM

    # NOTE: weight/bias blocks are constant across grid steps; their default
    # double-buffering is a few KiB of noise at these sizes, so we leave the
    # default pipelining alone rather than risk exotic pipeline_mode settings.
    out = pl.pallas_call(
        dnn_kernel,
        out_shape=jax.ShapeDtypeStruct((num_tiles, 1, tile), jnp.float32),
        grid_spec=pltpu.PrefetchScalarGridSpec(
            num_scalar_prefetch=0,
            grid=(num_tiles,),
            in_specs=[
                pl.BlockSpec((tile, input_dim), lambda i: (i, 0)),              # x, batch-tiled
                pl.BlockSpec((input_dim, first_hidden), lambda i: (0, 0)),      # w1 (resident)
                pl.BlockSpec((1, first_hidden), lambda i: (0, 0)),              # b1
                pl.BlockSpec((first_hidden, second_hidden), lambda i: (0, 0)),  # w2
                pl.BlockSpec((1, second_hidden), lambda i: (0, 0)),             # b2
                pl.BlockSpec((1, second_hidden), lambda i: (0, 0)),             # w3 as a row
                pl.BlockSpec(memory_space=pltpu.MemorySpace.SMEM),              # b3 scalar
            ],
            out_specs=pl.BlockSpec((1, 1, tile), lambda i: (i, 0, 0)),          # lane-dense rows
        ),
        compiler_params=pltpu.CompilerParams(
            dimension_semantics=("parallel",),
            # Keep <=32 MiB: v7x only has 64 MiB VMEM; buffers here are ~MBs.
            vmem_limit_bytes=32 * 1024 * 1024),
    )(x_p, w1_c, b1_c, w2_c, b2_c, w3_row, b3_c)

    return out.reshape(-1)[:n]


def dnn_forward(x, params, *, tile_m=8192, num_tcs=None, use_bf16=True):
    """x: [N, input_dim] float32 -> [N,] float32 (matches DNN.forward)."""
    if num_tcs is None:
        num_tcs = _num_tensorcores()
    return _dnn_forward(x, params, tile_m=int(tile_m), num_tcs=int(num_tcs),
                        use_bf16=bool(use_bf16))


def init_params(key, input_dim, first_hidden, second_hidden):
    """Deterministic synthetic init (PyTorch-Linear-like uniform ranges)."""
    ks = jax.random.split(key, 6)

    def lin(kw, kb, fan_in, fan_out):
        bound = 1.0 / jnp.sqrt(fan_in)
        w = jax.random.uniform(kw, (fan_in, fan_out), jnp.float32, -bound, bound)
        b = jax.random.uniform(kb, (1, fan_out), jnp.float32, -bound, bound)
        return w, b

    w1, b1 = lin(ks[0], ks[1], input_dim, first_hidden)
    w2, b2 = lin(ks[2], ks[3], first_hidden, second_hidden)
    w3, b3 = lin(ks[4], ks[5], second_hidden, 1)
    return (w1, b1, w2, b2, w3, b3)


def reference_forward(x, params, use_bf16=True):
    """Pure-JAX reference mirroring the kernel's numerics (bf16 matmul operands,
    f32 accumulate/bias; exact sigmoid -- the kernel's approx reciprocal differs
    by <~1e-3, covered by the test tolerance)."""
    w1, b1, w2, b2, w3, b3 = params
    hp = jax.lax.Precision.HIGHEST

    def q(a):
        return a.astype(jnp.bfloat16).astype(jnp.float32) if use_bf16 else a

    h1 = jax.nn.sigmoid(jnp.dot(q(x), q(w1), precision=hp) + b1.reshape(1, -1))
    h2 = jax.nn.sigmoid(jnp.dot(q(h1), q(w2), precision=hp) + b2.reshape(1, -1))
    out = jnp.dot(q(h2), q(w3).reshape(-1, 1), precision=hp) + b3.reshape(1, 1)
    return out.reshape(-1)


if __name__ == "__main__":
    N, INPUT_DIM, FIRST_HIDDEN, SECOND_HIDDEN = 200, 32, 64, 32

    key = jax.random.PRNGKey(0)
    kx, kp = jax.random.split(key)
    x = jax.random.normal(kx, (N, INPUT_DIM), jnp.float32)
    params = init_params(kp, INPUT_DIM, FIRST_HIDDEN, SECOND_HIDDEN)

    ref = reference_forward(x, params)

    # Default path: one big balanced tile (200 -> 256 rows), auto-detected TC count.
    out_default = jax.block_until_ready(dnn_forward(x, params))
    # Multi-tile path: small tile forces a 2-step parallel grid + zero padding.
    out_tiled = jax.block_until_ready(dnn_forward(x, params, tile_m=128, num_tcs=1))
    # Forced even split: exercises the v7x-style 2-TC balanced grid on any backend.
    out_split = jax.block_until_ready(dnn_forward(x, params, num_tcs=2))

    for name, out in (("default", out_default), ("tiled", out_tiled), ("split", out_split)):
        assert out.shape == (N,), name
        assert jnp.allclose(out, ref, atol=2e-3, rtol=2e-3), f"{name} mismatch vs reference"

    print("KERNEL_OK")
</pallas_src>

<mosaic_0001>
module attributes {stable_mosaic.version = 11 : i64} {
  func.func @dnn_kernel(%arg0: i32, %arg1: memref<256x32xbf16, #tpu.memory_space<vmem>>, %arg2: memref<32x64xbf16, #tpu.memory_space<vmem>>, %arg3: memref<1x64xf32, #tpu.memory_space<vmem>>, %arg4: memref<64x32xbf16, #tpu.memory_space<vmem>>, %arg5: memref<1x32xf32, #tpu.memory_space<vmem>>, %arg6: memref<1x32xbf16, #tpu.memory_space<vmem>>, %arg7: memref<1x1xf32, #tpu.memory_space<smem>>, %arg8: memref<1x1x256xf32, #tpu.memory_space<vmem>>) attributes {dimension_semantics = [#tpu.dimension_semantics<parallel>], iteration_bounds = array<i64: 1>, scalar_prefetch = 0 : i64, scratch_operands = 0 : i64, tpu.core_type = #tpu.core_type<tc>, window_params = [{transform_indices = @transform_0, window_bounds = array<i64: 256, 32>}, {pipeline_mode = #tpu.pipeline_mode<synchronous>, transform_indices = @transform_1, window_bounds = array<i64: 32, 64>}, {pipeline_mode = #tpu.pipeline_mode<synchronous>, transform_indices = @transform_2, window_bounds = array<i64: 1, 64>}, {pipeline_mode = #tpu.pipeline_mode<synchronous>, transform_indices = @transform_3, window_bounds = array<i64: 64, 32>}, {pipeline_mode = #tpu.pipeline_mode<synchronous>, transform_indices = @transform_4, window_bounds = array<i64: 1, 32>}, {pipeline_mode = #tpu.pipeline_mode<synchronous>, transform_indices = @transform_5, window_bounds = array<i64: 1, 32>}, {transform_indices = @transform_6, window_bounds = array<i64: 1, 1>}, {transform_indices = @transform_7, window_bounds = array<i64: 1, 1, 256>}]} {
    %c0 = arith.constant 0 : index
    %c0_0 = arith.constant 0 : index
    %0 = vector.load %arg1[%c0, %c0_0] : memref<256x32xbf16, #tpu.memory_space<vmem>>, vector<256x32xbf16>
    %c0_1 = arith.constant 0 : index
    %c0_2 = arith.constant 0 : index
    %1 = vector.load %arg2[%c0_1, %c0_2] : memref<32x64xbf16, #tpu.memory_space<vmem>>, vector<32x64xbf16>
    %cst = arith.constant dense<0.000000e+00> : vector<256x64xf32>
    %2 = tpu.matmul %0, %1, %cst {dimension_numbers = #tpu.dot_dimension_numbers<[1], [0], [0], [1], [0, 0, 1, 1], [], []>} : vector<256x32xbf16>, vector<32x64xbf16>, vector<256x64xf32> -> vector<256x64xf32>
    %c0_3 = arith.constant 0 : index
    %c0_4 = arith.constant 0 : index
    %3 = vector.load %arg3[%c0_3, %c0_4] : memref<1x64xf32, #tpu.memory_space<vmem>>, vector<1x64xf32>
    %4 = vector.broadcast %3 : vector<1x64xf32> to vector<256x64xf32>
    %5 = arith.addf %2, %4 : vector<256x64xf32>
    %cst_5 = arith.constant 0.000000e+00 : f32
    %6 = vector.broadcast %cst_5 : f32 to vector<256x64xf32>
    %7 = arith.subf %6, %5 : vector<256x64xf32>
    %8 = math.exp %7 : vector<256x64xf32>
    %cst_6 = arith.constant 1.000000e+00 : f32
    %9 = vector.broadcast %cst_6 : f32 to vector<256x64xf32>
    %10 = arith.addf %9, %8 : vector<256x64xf32>
    %11 = tpu.reciprocal %10 {approx = true} : vector<256x64xf32> -> vector<256x64xf32>
    %12 = arith.truncf %11 : vector<256x64xf32> to vector<256x64xbf16>
    %c0_7 = arith.constant 0 : index
    %c0_8 = arith.constant 0 : index
    %13 = vector.load %arg4[%c0_7, %c0_8] : memref<64x32xbf16, #tpu.memory_space<vmem>>, vector<64x32xbf16>
    %cst_9 = arith.constant dense<0.000000e+00> : vector<256x32xf32>
    %14 = tpu.matmul %12, %13, %cst_9 {dimension_numbers = #tpu.dot_dimension_numbers<[1], [0], [0], [1], [0, 0, 1, 1], [], []>} : vector<256x64xbf16>, vector<64x32xbf16>, vector<256x32xf32> -> vector<256x32xf32>
    %c0_10 = arith.constant 0 : index
    %c0_11 = arith.constant 0 : index
    %15 = vector.load %arg5[%c0_10, %c0_11] : memref<1x32xf32, #tpu.memory_space<vmem>>, vector<1x32xf32>
    %16 = vector.broadcast %15 : vector<1x32xf32> to vector<256x32xf32>
    %17 = arith.addf %14, %16 : vector<256x32xf32>
    %cst_12 = arith.constant 0.000000e+00 : f32
    %18 = vector.broadcast %cst_12 : f32 to vector<256x32xf32>
    %19 = arith.subf %18, %17 : vector<256x32xf32>
    %20 = math.exp %19 : vector<256x32xf32>
    %cst_13 = arith.constant 1.000000e+00 : f32
    %21 = vector.broadcast %cst_13 : f32 to vector<256x32xf32>
    %22 = arith.addf %21, %20 : vector<256x32xf32>
    %23 = tpu.reciprocal %22 {approx = true} : vector<256x32xf32> -> vector<256x32xf32>
    %c0_14 = arith.constant 0 : index
    %c0_15 = arith.constant 0 : index
    %24 = vector.load %arg6[%c0_14, %c0_15] : memref<1x32xbf16, #tpu.memory_space<vmem>>, vector<1x32xbf16>
    %25 = arith.truncf %23 : vector<256x32xf32> to vector<256x32xbf16>
    %cst_16 = arith.constant dense<0.000000e+00> : vector<1x256xf32>
    %26 = tpu.matmul %24, %25, %cst_16 {dimension_numbers = #tpu.dot_dimension_numbers<[1], [1], [0], [0], [0, 0, 1, 0], [], []>} : vector<1x32xbf16>, vector<256x32xbf16>, vector<1x256xf32> -> vector<1x256xf32>
    %c0_17 = arith.constant 0 : index
    %c0_18 = arith.constant 0 : index
    %27 = memref.load %arg7[%c0_17, %c0_18] : memref<1x1xf32, #tpu.memory_space<smem>>
    %28 = vector.broadcast %27 : f32 to vector<1x256xf32>
    %29 = arith.addf %26, %28 : vector<1x256xf32>
    %c0_19 = arith.constant 0 : index
    %c0_20 = arith.constant 0 : index
    %c0_21 = arith.constant 0 : index
    %30 = vector.load %arg8[%c0_19, %c0_20, %c0_21] : memref<1x1x256xf32, #tpu.memory_space<vmem>>, vector<1x1x256xf32>
    %31 = vector.shape_cast %30 : vector<1x1x256xf32> to vector<1x256xf32>
    %32 = vector.shape_cast %29 : vector<1x256xf32> to vector<1x1x256xf32>
    tpu.vector_store %arg8[%c0_19, %c0_20, %c0_21], %32 {strides = array<i32>} : memref<1x1x256xf32, #tpu.memory_space<vmem>>, vector<1x1x256xf32>,
    return
  }
  func.func @transform_0(%arg0: i32) -> (i32, i32) {
    %c0_i32 = arith.constant 0 : i32
    %c0_i32_0 = arith.constant 0 : i32
    return %arg0, %c0_i32 : i32, i32
  }
  func.func @transform_1(%arg0: i32) -> (i32, i32) {
    %c0_i32 = arith.constant 0 : i32
    %c0_i32_0 = arith.constant 0 : i32
    %c0_i32_1 = arith.constant 0 : i32
    return %c0_i32, %c0_i32_0 : i32, i32
  }
  func.func @transform_2(%arg0: i32) -> (i32, i32) {
    %c0_i32 = arith.constant 0 : i32
    %c0_i32_0 = arith.constant 0 : i32
    %c0_i32_1 = arith.constant 0 : i32
    return %c0_i32, %c0_i32_0 : i32, i32
  }
  func.func @transform_3(%arg0: i32) -> (i32, i32) {
    %c0_i32 = arith.constant 0 : i32
    %c0_i32_0 = arith.constant 0 : i32
    %c0_i32_1 = arith.constant 0 : i32
    return %c0_i32, %c0_i32_0 : i32, i32
  }
  func.func @transform_4(%arg0: i32) -> (i32, i32) {
    %c0_i32 = arith.constant 0 : i32
    %c0_i32_0 = arith.constant 0 : i32
    %c0_i32_1 = arith.constant 0 : i32
    return %c0_i32, %c0_i32_0 : i32, i32
  }
  func.func @transform_5(%arg0: i32) -> (i32, i32) {
    %c0_i32 = arith.constant 0 : i32
    %c0_i32_0 = arith.constant 0 : i32
    %c0_i32_1 = arith.constant 0 : i32
    return %c0_i32, %c0_i32_0 : i32, i32
  }
  func.func @transform_6(%arg0: i32) -> (i32, i32) {
    %c0_i32 = arith.constant 0 : i32
    %c0_i32_0 = arith.constant 0 : i32
    %c0_i32_1 = arith.constant 0 : i32
    return %c0_i32, %c0_i32_0 : i32, i32
  }
  func.func @transform_7(%arg0: i32) -> (i32, i32, i32) {
    %c0_i32 = arith.constant 0 : i32
    %c0_i32_0 = arith.constant 0 : i32
    %c0_i32_1 = arith.constant 0 : i32
    return %arg0, %c0_i32, %c0_i32_0 : i32, i32, i32
  }
}

</mosaic_0001>

<bundles_post_ra>
// kernel: _dnn_forward.1
= control target key start
LH: loop header
LB: loop body
LE: loop exit
PB: predicated region body
PF: predicated region fallthrough
CT: control target
= control target key end

     0   :  { %s1691_s0 = inlined_call_operand.vmem [shape: bf16[256,32], index: 0, kind: input, shape index: {}]   ;;  %s1692_s1 = inlined_call_operand.vmem [shape: bf16[32,64], index: 1, kind: input, shape index: {}]   ;;  %s1693_s2 = inlined_call_operand.vmem [shape: f32[1,64], index: 2, kind: input, shape index: {}]   ;;  %s1694_s3 = inlined_call_operand.vmem [shape: bf16[64,32], index: 3, kind: input, shape index: {}]   ;;  %s1695_s4 = inlined_call_operand.vmem [shape: f32[1,32], index: 4, kind: input, shape index: {}]   ;;  %s1696_s5 = inlined_call_operand.vmem [shape: bf16[1,32], index: 5, kind: input, shape index: {}]   ;;  %s1697_s6 = inlined_call_operand.<no memory space> [shape: f32[1,1], index: 6, kind: input, shape index: {}]   ;;  %s1698_s7 = inlined_call_operand.hbm [shape: f32[1,1,256], index: 7, kind: output, shape index: {}]  }
   0x1   :  { %v1071_v0 = vld [vmem:[%s1692_s1 + $0x8] sm:$0xff]  ;;  %v1070_v1 = vld [vmem:[%s1692_s1] sm:$0xff] }
   0x2   :  { %216 = vmatpush.bf16.msra.mxu0 %v1071_v0  ;;  %1076 = vmatpush.bf16.msra.mxu3 %v1071_v0 }
   0x3   :  { %13 = vsyncpa [#allocation4], 0  ;;  %v1054_v2 = vld [vmem:[%s1691_s0] sm:$0xff]  ;;  %v1063_v3 = vld [vmem:[%s1691_s0 + $0x48] sm:$0xff]  ;;  %vm161_vm0 = vcmask 261120   ;;  %vm511_vm1 = vcmask 523264  }
   0x4   :  { %v1055_v4 = vld [vmem:[%s1691_s0 + $0x8] sm:$0xff]  ;;  %v1064_v5 = vld [vmem:[%s1691_s0 + $0x50] sm:$0xff]  ;;  %v1065_v7 = vld [vmem:[%s1691_s0 + $0x58] sm:$0xff]  ;;  %s1367_s24 = smov [#allocation3]   ;;  %s923_s28 = sshll.u32 %s1698_s7, 4  ;;  %vm908_vm2 = vcmask 1040384   ;;  %s924_s28 = int_to_ptr.hbm [resolvable:$true] %s923_s28 }
   0x5   :  { %v1056_v6 = vld [vmem:[%s1691_s0 + $0x10] sm:$0xff]  ;;  %v1057_v8 = vld [vmem:[%s1691_s0 + $0x18] sm:$0xff]  ;;  %v1066_v9 = vld [vmem:[%s1691_s0 + $0x60] sm:$0xff]  ;;  %s921_s25 = sshll.u32 %s1367_s24, 4  ;;  %s922_s25 = int_to_ptr.vmem [resolvable:$true] %s921_s25 }
   0x6   :  { %217 = vmatpush.bf16.msra.mxu0 %v1070_v1  ;;  %1077 = vmatpush.bf16.msra.mxu3 %v1070_v1  ;;  %v1058_v10 = vld [vmem:[%s1691_s0 + $0x20] sm:$0xff]  ;;  %v1067_v11 = vld [vmem:[%s1691_s0 + $0x68] sm:$0xff]  ;;  %v1068_v13 = vld [vmem:[%s1691_s0 + $0x70] sm:$0xff] }
   0x7   :  { %v1059_v12 = vld [vmem:[%s1691_s0 + $0x28] sm:$0xff]  ;;  %v1060_v14 = vld [vmem:[%s1691_s0 + $0x30] sm:$0xff]  ;;  %v1069_v15 = vld [vmem:[%s1691_s0 + $0x78] sm:$0xff] }
   0x8   :  { %v1061_v16 = vld [vmem:[%s1691_s0 + $0x38] sm:$0xff]  ;;  %v1074_v18 = vld [vmem:[%s1694_s3 + $0x10] sm:$0xff]  ;;  %v1073_v19 = vld [vmem:[%s1694_s3 + $0x8] sm:$0xff] }
   0x9   :  { %1004 = vmatmul.msk.bf16.vlgmr.msra.gmra.mxu0 %vm161_vm0, %v1054_v2  ;;  %1013 = vmatmul.msk.bf16.vlgmr.msra.gmra.mxu3 %vm161_vm0, %v1063_v3  ;;  %v1075_v17 = vld [vmem:[%s1694_s3 + $0x18] sm:$0xff]  ;;  %v1072_v20 = vld [vmem:[%s1694_s3] sm:$0xff] }
   0xa   :  { %564 = vmatpush.bf16.msra.mxu1 %v1075_v17  ;;  %1078 = vmatpush.bf16.msra.mxu2 %v1075_v17  ;;  %v1489_v21 = vld [vmem:[%s1693_s2] ss:$0 sm:$0xff] }
   0xb   :  { %v1062_v22 = vld [vmem:[%s1691_s0 + $0x40] sm:$0xff] }
   0xe   :  { %565 = vmatpush.bf16.msra.mxu1 %v1074_v18  ;;  %1079 = vmatpush.bf16.msra.mxu2 %v1074_v18 }
  0x12   :  { %566 = vmatpush.bf16.msra.mxu1 %v1073_v19  ;;  %1080 = vmatpush.bf16.msra.mxu2 %v1073_v19 }
  0x16   :  { %567 = vmatpush.bf16.msra.mxu1 %v1072_v20  ;;  %1081 = vmatpush.bf16.msra.mxu2 %v1072_v20 }
  0x19   :  { %1005 = vmatmul.msk.bf16.gmra.mxu0 %vm161_vm0, %v1055_v4  ;;  %1014 = vmatmul.msk.bf16.gmra.mxu3 %vm161_vm0, %v1064_v5 }
  0x29   :  { %1006 = vmatmul.msk.bf16.gmra.mxu0 %vm161_vm0, %v1056_v6  ;;  %1015 = vmatmul.msk.bf16.gmra.mxu3 %vm161_vm0, %v1065_v7 }
  0x39   :  { %1007 = vmatmul.msk.bf16.gmra.mxu0 %vm161_vm0, %v1057_v8  ;;  %1016 = vmatmul.msk.bf16.gmra.mxu3 %vm161_vm0, %v1066_v9 }
  0x49   :  { %1008 = vmatmul.msk.bf16.gmra.mxu0 %vm161_vm0, %v1058_v10  ;;  %1017 = vmatmul.msk.bf16.gmra.mxu3 %vm161_vm0, %v1067_v11 }
  0x59   :  { %1009 = vmatmul.msk.bf16.gmra.mxu0 %vm161_vm0, %v1059_v12  ;;  %1018 = vmatmul.msk.bf16.gmra.mxu3 %vm161_vm0, %v1068_v13 }
  0x69   :  { %1010 = vmatmul.msk.bf16.gmra.mxu0 %vm161_vm0, %v1060_v14  ;;  %1019 = vmatmul.msk.bf16.gmra.mxu3 %vm161_vm0, %v1069_v15 }
  0x79   :  { %1011 = vmatmul.msk.bf16.gmra.mxu0 %vm161_vm0, %v1061_v16 }
  0x86   :  { %v219_v23 = vpop.f32.mrf.mxu0 }
  0x87   :  { %v220_v24 = vadd.f32 %v1489_v21, %v219_v23 }
  0x89   :  { %v299_v25 = vsub.f32 0.0, %v220_v24  ;;  %1012 = vmatmul.msk.bf16.gmra.mxu0 %vm161_vm0, %v1062_v22 }
  0x8b   :  { %v331_v26 = vmul.f32 1.442695, %v299_v25 }
  0x8c   :  { %v264_v27 = vpop.f32.mrf.mxu3 }
  0x8d   :  { %v265_v28 = vadd.f32 %v1489_v21, %v264_v27  ;;  %1085 = vpow2.f32 %v331_v26 }
  0x8e   :  { %v221_v29 = vpop.f32.mrf.mxu0 }
  0x8f   :  { %v317_v30 = vsub.f32 0.0, %v265_v28  ;;  %v222_v31 = vadd.f32 %v1489_v21, %v221_v29 }
  0x91   :  { %v300_v32 = vsub.f32 0.0, %v222_v31  ;;  %v367_v33 = vmul.f32 1.442695, %v317_v30 }
  0x93   :  { %v333_v34 = vmul.f32 1.442695, %v300_v32  ;;  %v1086_v37 = vpop.eup %1085 }
  0x94   :  { %v266_v35 = vpop.f32.mrf.mxu3  ;;  %v395_v41 = vadd.f32 1.0, %v1086_v37 }
  0x95   :  { %1087 = vpow2.f32 %v333_v34  ;;  %v267_v36 = vadd.f32 %v1489_v21, %v266_v35 }
  0x96   :  { %1089 = vpow2.f32 %v367_v33  ;;  %v224_v38 = vpop.f32.mrf.mxu0 }
  0x97   :  { %v318_v39 = vsub.f32 0.0, %v267_v36  ;;  %v225_v40 = vadd.f32 %v1489_v21, %v224_v38 }
  0x99   :  { %v369_v42 = vmul.f32 1.442695, %v318_v39  ;;  %v301_v43 = vsub.f32 0.0, %v225_v40 }
  0x9b   :  { %v1088_v44 = vpop.eup %1087  ;;  %1091 = vpow2.f32 %v369_v42  ;;  %v335_v47 = vmul.f32 1.442695, %v301_v43 }
  0x9c   :  { %v1090_v45 = vpop.eup %1089  ;;  %v396_v46 = vadd.f32 1.0, %v1088_v44  ;;  %v269_v48 = vpop.f32.mrf.mxu3  ;;  %1093 = vrcp.f32 %v395_v41 }
  0x9d   :  { %v270_v49 = vadd.f32 %v1489_v21, %v269_v48  ;;  %v413_v51 = vadd.f32 1.0, %v1090_v45 }
  0x9e   :  { %1095 = vrcp.f32 %v396_v46  ;;  %v226_v50 = vpop.f32.mrf.mxu0 }
  0x9f   :  { %v319_v52 = vsub.f32 0.0, %v270_v49  ;;  %v227_v53 = vadd.f32 %v1489_v21, %v226_v50  ;;  %1097 = vpow2.f32 %v335_v47 }
  0xa0   :  { %1099 = vrcp.f32 %v413_v51 }
  0xa1   :  { %v1092_v54 = vpop.eup %1091  ;;  %v302_v55 = vsub.f32 0.0, %v227_v53  ;;  %v371_v57 = vmul.f32 1.442695, %v319_v52 }
  0xa2   :  { %v414_v56 = vadd.f32 1.0, %v1092_v54  ;;  %v1094_v58 = vpop.eup %1093 }
  0xa3   :  { %v337_v59 = vmul.f32 1.442695, %v302_v55 }
  0xa4   :  { %v1096_v60 = vpop.eup %1095  ;;  %1101 = vrcp.f32 %v414_v56  ;;  %v271_v61 = vpop.f32.mrf.mxu3 }
  0xa5   :  { %1103 = vpow2.f32 %v337_v59  ;;  %v272_v62 = vadd.f32 %v1489_v21, %v271_v61  ;;  %v459_v63 = vpack.c.bf16 %v1096_v60, %v1094_v58  ;;  %v1098_v0 = vpop.eup %1097 }
  0xa6   :  { %1105 = vpow2.f32 %v371_v57  ;;  %v229_v1 = vpop.f32.mrf.mxu0  ;;  %v1505_v4 = vpop.eup %1099  ;;  %v397_v5 = vadd.f32 1.0, %v1098_v0 }
  0xa7   :  { %v320_v2 = vsub.f32 0.0, %v272_v62  ;;  %v230_v3 = vadd.f32 %v1489_v21, %v229_v1  ;;  %1036 = vmatmul.msk.bf16.vlgmr.msra.gmra.mxu1 %vm511_vm1, %v459_v63 }
  0xa9   :  { %v373_v6 = vmul.f32 1.442695, %v320_v2  ;;  %v303_v7 = vsub.f32 0.0, %v230_v3 }
  0xaa   :  { %v1507_v8 = vpop.eup %1101 }
  0xab   :  { %v1104_v9 = vpop.eup %1103  ;;  %1107 = vpow2.f32 %v373_v6  ;;  %v468_v10 = vpack.c.bf16 %v1507_v8, %v1505_v4  ;;  %v339_v13 = vmul.f32 1.442695, %v303_v7 }
  0xac   :  { %v1106_v11 = vpop.eup %1105  ;;  %v398_v12 = vadd.f32 1.0, %v1104_v9  ;;  %v274_v14 = vpop.f32.mrf.mxu3  ;;  %1109 = vrcp.f32 %v397_v5 }
  0xad   :  { %v275_v15 = vadd.f32 %v1489_v21, %v274_v14  ;;  %v415_v17 = vadd.f32 1.0, %v1106_v11 }
  0xae   :  { %1111 = vrcp.f32 %v398_v12  ;;  %v231_v16 = vpop.f32.mrf.mxu0 }
  0xaf   :  { %v321_v18 = vsub.f32 0.0, %v275_v15  ;;  %v232_v19 = vadd.f32 %v1489_v21, %v231_v16  ;;  %1113 = vpow2.f32 %v339_v13 }
  0xb0   :  { %1115 = vrcp.f32 %v415_v17 }
  0xb1   :  { %v1108_v20 = vpop.eup %1107  ;;  %v304_v22 = vsub.f32 0.0, %v232_v19  ;;  %v375_v24 = vmul.f32 1.442695, %v321_v18 }
  0xb2   :  { %v416_v23 = vadd.f32 1.0, %v1108_v20  ;;  %v1110_v25 = vpop.eup %1109 }
  0xb3   :  { %v341_v26 = vmul.f32 1.442695, %v304_v22 }
  0xb4   :  { %v1112_v27 = vpop.eup %1111  ;;  %1117 = vrcp.f32 %v416_v23  ;;  %v276_v28 = vpop.f32.mrf.mxu3 }
  0xb5   :  { %1119 = vpow2.f32 %v341_v26  ;;  %v277_v29 = vadd.f32 %v1489_v21, %v276_v28  ;;  %v460_v30 = vpack.c.bf16 %v1112_v27, %v1110_v25  ;;  %v1114_v31 = vpop.eup %1113 }
  0xb6   :  { %1121 = vpow2.f32 %v375_v24  ;;  %v234_v32 = vpop.f32.mrf.mxu0  ;;  %v1116_v35 = vpop.eup %1115  ;;  %v399_v36 = vadd.f32 1.0, %v1114_v31 }
  0xb7   :  { %v322_v33 = vsub.f32 0.0, %v277_v29  ;;  %v235_v34 = vadd.f32 %v1489_v21, %v234_v32  ;;  %1037 = vmatmul.msk.bf16.gmra.mxu1 %vm511_vm1, %v460_v30 }
  0xb9   :  { %v377_v37 = vmul.f32 1.442695, %v322_v33  ;;  %v305_v38 = vsub.f32 0.0, %v235_v34 }
  0xba   :  { %v1118_v39 = vpop.eup %1117 }
  0xbb   :  { %v1120_v40 = vpop.eup %1119  ;;  %1123 = vpow2.f32 %v377_v37  ;;  %v469_v41 = vpack.c.bf16 %v1118_v39, %v1116_v35  ;;  %v343_v44 = vmul.f32 1.442695, %v305_v38 }
  0xbc   :  { %v1122_v42 = vpop.eup %1121  ;;  %v400_v43 = vadd.f32 1.0, %v1120_v40  ;;  %v279_v45 = vpop.f32.mrf.mxu3  ;;  %1125 = vrcp.f32 %v399_v36 }
  0xbd   :  { %v280_v46 = vadd.f32 %v1489_v21, %v279_v45  ;;  %1046 = vmatmul.msk.bf16.vlgmr.msra.gmra.mxu2 %vm511_vm1, %v469_v41  ;;  %v417_v48 = vadd.f32 1.0, %v1122_v42 }
  0xbe   :  { %1127 = vrcp.f32 %v400_v43  ;;  %v236_v47 = vpop.f32.mrf.mxu0 }
  0xbf   :  { %v323_v49 = vsub.f32 0.0, %v280_v46  ;;  %v237_v50 = vadd.f32 %v1489_v21, %v236_v47  ;;  %1129 = vpow2.f32 %v343_v44 }
  0xc0   :  { %1131 = vrcp.f32 %v417_v48 }
  0xc1   :  { %v1124_v51 = vpop.eup %1123  ;;  %v306_v52 = vsub.f32 0.0, %v237_v50  ;;  %v379_v54 = vmul.f32 1.442695, %v323_v49 }
  0xc2   :  { %v418_v53 = vadd.f32 1.0, %v1124_v51  ;;  %v1126_v55 = vpop.eup %1125 }
  0xc3   :  { %v345_v56 = vmul.f32 1.442695, %v306_v52 }
  0xc4   :  { %v1128_v57 = vpop.eup %1127  ;;  %1133 = vrcp.f32 %v418_v53  ;;  %v281_v58 = vpop.f32.mrf.mxu3 }
  0xc5   :  { %1135 = vpow2.f32 %v345_v56  ;;  %v282_v59 = vadd.f32 %v1489_v21, %v281_v58  ;;  %v461_v60 = vpack.c.bf16 %v1128_v57, %v1126_v55  ;;  %v1130_v61 = vpop.eup %1129 }
  0xc6   :  { %1137 = vpow2.f32 %v379_v54  ;;  %v239_v62 = vpop.f32.mrf.mxu0  ;;  %v1132_v1 = vpop.eup %1131  ;;  %v401_v2 = vadd.f32 1.0, %v1130_v61 }
  0xc7   :  { %v324_v63 = vsub.f32 0.0, %v282_v59  ;;  %v240_v0 = vadd.f32 %v1489_v21, %v239_v62  ;;  %1038 = vmatmul.msk.bf16.gmra.mxu1 %vm511_vm1, %v461_v60 }
  0xc9   :  { %v381_v3 = vmul.f32 1.442695, %v324_v63  ;;  %v307_v5 = vsub.f32 0.0, %v240_v0 }
  0xca   :  { %v1134_v6 = vpop.eup %1133 }
  0xcb   :  { %v1136_v7 = vpop.eup %1135  ;;  %1139 = vpow2.f32 %v381_v3  ;;  %v470_v9 = vpack.c.bf16 %v1134_v6, %v1132_v1  ;;  %v347_v13 = vmul.f32 1.442695, %v307_v5 }
  0xcc   :  { %v1138_v11 = vpop.eup %1137  ;;  %v402_v12 = vadd.f32 1.0, %v1136_v7  ;;  %v284_v14 = vpop.f32.mrf.mxu3  ;;  %1141 = vrcp.f32 %v401_v2 }
  0xcd   :  { %v285_v15 = vadd.f32 %v1489_v21, %v284_v14  ;;  %1047 = vmatmul.msk.bf16.gmra.mxu2 %vm511_vm1, %v470_v9  ;;  %v419_v17 = vadd.f32 1.0, %v1138_v11 }
  0xce   :  { %1143 = vrcp.f32 %v402_v12  ;;  %v241_v16 = vpop.f32.mrf.mxu0 }
  0xcf   :  { %v325_v18 = vsub.f32 0.0, %v285_v15  ;;  %v242_v19 = vadd.f32 %v1489_v21, %v241_v16  ;;  %1145 = vpow2.f32 %v347_v13 }
  0xd0   :  { %1147 = vrcp.f32 %v419_v17 }
  0xd1   :  { %v1140_v20 = vpop.eup %1139  ;;  %v308_v22 = vsub.f32 0.0, %v242_v19  ;;  %v383_v24 = vmul.f32 1.442695, %v325_v18 }
  0xd2   :  { %v420_v23 = vadd.f32 1.0, %v1140_v20  ;;  %v1142_v25 = vpop.eup %1141 }
  0xd3   :  { %v349_v26 = vmul.f32 1.442695, %v308_v22 }
  0xd4   :  { %v1144_v27 = vpop.eup %1143  ;;  %1149 = vrcp.f32 %v420_v23  ;;  %v286_v28 = vpop.f32.mrf.mxu3 }
  0xd5   :  { %1151 = vpow2.f32 %v349_v26  ;;  %v287_v29 = vadd.f32 %v1489_v21, %v286_v28  ;;  %v462_v30 = vpack.c.bf16 %v1144_v27, %v1142_v25  ;;  %v1146_v31 = vpop.eup %1145 }
  0xd6   :  { %1153 = vpow2.f32 %v383_v24  ;;  %v244_v32 = vpop.f32.mrf.mxu0  ;;  %v1148_v35 = vpop.eup %1147  ;;  %v403_v36 = vadd.f32 1.0, %v1146_v31 }
  0xd7   :  { %v326_v33 = vsub.f32 0.0, %v287_v29  ;;  %v245_v34 = vadd.f32 %v1489_v21, %v244_v32  ;;  %1039 = vmatmul.msk.bf16.gmra.mxu1 %vm511_vm1, %v462_v30 }
  0xd9   :  { %v385_v37 = vmul.f32 1.442695, %v326_v33  ;;  %v309_v38 = vsub.f32 0.0, %v245_v34 }
  0xda   :  { %v1150_v39 = vpop.eup %1149 }
  0xdb   :  { %v1152_v40 = vpop.eup %1151  ;;  %1155 = vpow2.f32 %v385_v37  ;;  %v471_v41 = vpack.c.bf16 %v1150_v39, %v1148_v35  ;;  %v351_v44 = vmul.f32 1.442695, %v309_v38 }
  0xdc   :  { %v1154_v42 = vpop.eup %1153  ;;  %v404_v43 = vadd.f32 1.0, %v1152_v40  ;;  %v289_v45 = vpop.f32.mrf.mxu3  ;;  %1157 = vrcp.f32 %v403_v36 }
  0xdd   :  { %v290_v46 = vadd.f32 %v1489_v21, %v289_v45  ;;  %1048 = vmatmul.msk.bf16.gmra.mxu2 %vm511_vm1, %v471_v41  ;;  %v421_v48 = vadd.f32 1.0, %v1154_v42 }
  0xde   :  { %1159 = vrcp.f32 %v404_v43  ;;  %v246_v47 = vpop.f32.mrf.mxu0 }
  0xdf   :  { %v327_v49 = vsub.f32 0.0, %v290_v46  ;;  %v247_v50 = vadd.f32 %v1489_v21, %v246_v47  ;;  %1161 = vpow2.f32 %v351_v44 }
  0xe0   :  { %1163 = vrcp.f32 %v421_v48 }
  0xe1   :  { %v1156_v51 = vpop.eup %1155  ;;  %v310_v52 = vsub.f32 0.0, %v247_v50  ;;  %v387_v54 = vmul.f32 1.442695, %v327_v49 }
  0xe2   :  { %v422_v53 = vadd.f32 1.0, %v1156_v51  ;;  %v1158_v55 = vpop.eup %1157 }
  0xe3   :  { %v353_v56 = vmul.f32 1.442695, %v310_v52 }
  0xe4   :  { %v1160_v57 = vpop.eup %1159  ;;  %1165 = vrcp.f32 %v422_v53  ;;  %v291_v58 = vpop.f32.mrf.mxu3 }
  0xe5   :  { %1167 = vpow2.f32 %v353_v56  ;;  %v292_v59 = vadd.f32 %v1489_v21, %v291_v58  ;;  %v463_v60 = vpack.c.bf16 %v1160_v57, %v1158_v55  ;;  %v1162_v61 = vpop.eup %1161 }
  0xe6   :  { %1169 = vpow2.f32 %v387_v54  ;;  %v249_v62 = vpop.f32.mrf.mxu0  ;;  %v1164_v1 = vpop.eup %1163  ;;  %v405_v2 = vadd.f32 1.0, %v1162_v61 }
  0xe7   :  { %v328_v63 = vsub.f32 0.0, %v292_v59  ;;  %v250_v0 = vadd.f32 %v1489_v21, %v249_v62  ;;  %1040 = vmatmul.msk.bf16.gmra.mxu1 %vm511_vm1, %v463_v60 }
  0xe9   :  { %v389_v3 = vmul.f32 1.442695, %v328_v63  ;;  %v311_v5 = vsub.f32 0.0, %v250_v0 }
  0xea   :  { %v1166_v6 = vpop.eup %1165 }
  0xeb   :  { %v1168_v7 = vpop.eup %1167  ;;  %1171 = vpow2.f32 %v389_v3  ;;  %v472_v9 = vpack.c.bf16 %v1166_v6, %v1164_v1  ;;  %v355_v13 = vmul.f32 1.442695, %v311_v5 }
  0xec   :  { %v1170_v11 = vpop.eup %1169  ;;  %v406_v12 = vadd.f32 1.0, %v1168_v7  ;;  %v294_v14 = vpop.f32.mrf.mxu3  ;;  %1173 = vrcp.f32 %v405_v2 }
  0xed   :  { %v295_v15 = vadd.f32 %v1489_v21, %v294_v14  ;;  %1049 = vmatmul.msk.bf16.gmra.mxu2 %vm511_vm1, %v472_v9  ;;  %v423_v17 = vadd.f32 1.0, %v1170_v11 }
  0xee   :  { %1175 = vrcp.f32 %v406_v12  ;;  %v251_v16 = vpop.f32.mrf.mxu0 }
  0xef   :  { %v329_v18 = vsub.f32 0.0, %v295_v15  ;;  %v252_v19 = vadd.f32 %v1489_v21, %v251_v16  ;;  %1177 = vpow2.f32 %v355_v13  ;;  %v1550_v16 = vld [vmem:[%s1695_s4] ss:$0 sm:$0xff] }
  0xf0   :  { %1179 = vrcp.f32 %v423_v17 }
  0xf1   :  { %v1172_v20 = vpop.eup %1171  ;;  %v312_v22 = vsub.f32 0.0, %v252_v19  ;;  %v391_v24 = vmul.f32 1.442695, %v329_v18 }
  0xf2   :  { %v424_v23 = vadd.f32 1.0, %v1172_v20  ;;  %v1174_v25 = vpop.eup %1173 }
  0xf3   :  { %v357_v26 = vmul.f32 1.442695, %v312_v22 }
  0xf4   :  { %v1176_v27 = vpop.eup %1175  ;;  %1181 = vrcp.f32 %v424_v23  ;;  %v296_v28 = vpop.f32.mrf.mxu3 }
  0xf5   :  { %1183 = vpow2.f32 %v357_v26  ;;  %v297_v29 = vadd.f32 %v1489_v21, %v296_v28  ;;  %v464_v30 = vpack.c.bf16 %v1176_v27, %v1174_v25  ;;  %v1178_v31 = vpop.eup %1177 }
  0xf6   :  { %1185 = vpow2.f32 %v391_v24  ;;  %v254_v32 = vpop.f32.mrf.mxu0  ;;  %v1180_v35 = vpop.eup %1179  ;;  %v407_v36 = vadd.f32 1.0, %v1178_v31 }
  0xf7   :  { %v330_v33 = vsub.f32 0.0, %v297_v29  ;;  %v255_v34 = vadd.f32 %v1489_v21, %v254_v32  ;;  %1041 = vmatmul.msk.bf16.gmra.mxu1 %vm511_vm1, %v464_v30 }
  0xf9   :  { %v393_v37 = vmul.f32 1.442695, %v330_v33  ;;  %v313_v38 = vsub.f32 0.0, %v255_v34 }
  0xfa   :  { %v1182_v39 = vpop.eup %1181 }
  0xfb   :  { %v1184_v40 = vpop.eup %1183  ;;  %1187 = vpow2.f32 %v393_v37  ;;  %v473_v41 = vpack.c.bf16 %v1182_v39, %v1180_v35  ;;  %v359_v44 = vmul.f32 1.442695, %v313_v38 }
  0xfc   :  { %v1186_v42 = vpop.eup %1185  ;;  %v408_v43 = vadd.f32 1.0, %v1184_v40  ;;  %1189 = vrcp.f32 %v407_v36 }
  0xfd   :  { %1050 = vmatmul.msk.bf16.gmra.mxu2 %vm511_vm1, %v473_v41  ;;  %v425_v46 = vadd.f32 1.0, %v1186_v42 }
  0xfe   :  { %1191 = vrcp.f32 %v408_v43  ;;  %v256_v45 = vpop.f32.mrf.mxu0 }
  0xff   :  { %v257_v47 = vadd.f32 %v1489_v21, %v256_v45  ;;  %1193 = vpow2.f32 %v359_v44 }
 0x100   :  { %1195 = vrcp.f32 %v425_v46 }
 0x101   :  { %v1188_v48 = vpop.eup %1187  ;;  %v314_v49 = vsub.f32 0.0, %v257_v47 }
 0x102   :  { %v426_v50 = vadd.f32 1.0, %v1188_v48  ;;  %v1190_v51 = vpop.eup %1189 }
 0x103   :  { %v361_v52 = vmul.f32 1.442695, %v314_v49 }
 0x104   :  { %v1192_v53 = vpop.eup %1191  ;;  %1197 = vrcp.f32 %v426_v50 }
 0x105   :  { %1199 = vpow2.f32 %v361_v52  ;;  %v465_v54 = vpack.c.bf16 %v1192_v53, %v1190_v51  ;;  %v1194_v55 = vpop.eup %1193 }
 0x106   :  { %v259_v56 = vpop.f32.mrf.mxu0  ;;  %v1196_v58 = vpop.eup %1195  ;;  %v409_v59 = vadd.f32 1.0, %v1194_v55 }
 0x107   :  { %v260_v57 = vadd.f32 %v1489_v21, %v259_v56  ;;  %1042 = vmatmul.msk.bf16.gmra.mxu1 %vm511_vm1, %v465_v54 }
 0x108   :  { %1201 = vrcp.f32 %v409_v59 }
 0x109   :  { %v315_v60 = vsub.f32 0.0, %v260_v57 }
 0x10a   :  { %v1198_v61 = vpop.eup %1197 }
 0x10b   :  { %v1200_v62 = vpop.eup %1199  ;;  %v363_v63 = vmul.f32 1.442695, %v315_v60  ;;  %v474_v0 = vpack.c.bf16 %v1198_v61, %v1196_v58 }
 0x10c   :  { %v410_v1 = vadd.f32 1.0, %v1200_v62 }
 0x10d   :  { %1051 = vmatmul.msk.bf16.gmra.mxu2 %vm511_vm1, %v474_v0 }
 0x10e   :  { %1203 = vrcp.f32 %v410_v1  ;;  %v261_v2 = vpop.f32.mrf.mxu0  ;;  %v1202_v6 = vpop.eup %1201 }
 0x10f   :  { %1205 = vpow2.f32 %v363_v63  ;;  %v262_v3 = vadd.f32 %v1489_v21, %v261_v2 }
 0x111   :  { %v316_v5 = vsub.f32 0.0, %v262_v3 }
 0x113   :  { %v365_v7 = vmul.f32 1.442695, %v316_v5 }
 0x114   :  { %v1204_v9 = vpop.eup %1203 }
 0x115   :  { %v1206_v11 = vpop.eup %1205  ;;  %1207 = vpow2.f32 %v365_v7  ;;  %v466_v12 = vpack.c.bf16 %v1204_v9, %v1202_v6 }
 0x116   :  { %v411_v13 = vadd.f32 1.0, %v1206_v11 }
 0x117   :  { %1043 = vmatmul.msk.bf16.gmra.mxu1 %vm511_vm1, %v466_v12 }
 0x118   :  { %1209 = vrcp.f32 %v411_v13 }
 0x11b   :  { %v1208_v14 = vpop.eup %1207 }
 0x11c   :  { %v412_v15 = vadd.f32 1.0, %v1208_v14 }
 0x11e   :  { %1211 = vrcp.f32 %v412_v15  ;;  %v1210_v21 = vpop.eup %1209 }
 0x124   :  { %v1212_v17 = vpop.eup %1211  ;;  %v569_v18 = vpop.f32.mrf.mxu1 }
 0x125   :  { %v570_v19 = vadd.f32 %v1550_v16, %v569_v18  ;;  %v467_v20 = vpack.c.bf16 %v1212_v17, %v1210_v21 }
 0x127   :  { %v649_v22 = vsub.f32 0.0, %v570_v19  ;;  %1044 = vmatmul.msk.bf16.gmra.mxu1 %vm511_vm1, %v467_v20 }
 0x129   :  { %v681_v23 = vmul.f32 1.442695, %v649_v22 }
 0x12b   :  { %1213 = vpow2.f32 %v681_v23 }
 0x12c   :  { %v571_v24 = vpop.f32.mrf.mxu1 }
 0x12d   :  { %v572_v25 = vadd.f32 %v1550_v16, %v571_v24 }
 0x12f   :  { %v650_v26 = vsub.f32 0.0, %v572_v25 }
 0x131   :  { %v683_v27 = vmul.f32 1.442695, %v650_v26  ;;  %v1214_v28 = vpop.eup %1213 }
 0x132   :  { %v745_v31 = vadd.f32 1.0, %v1214_v28 }
 0x133   :  { %1215 = vpow2.f32 %v683_v27 }
 0x134   :  { %v574_v29 = vpop.f32.mrf.mxu1  ;;  %1217 = vrcp.f32 %v745_v31 }
 0x135   :  { %v575_v30 = vadd.f32 %v1550_v16, %v574_v29 }
 0x137   :  { %v651_v32 = vsub.f32 0.0, %v575_v30  ;;  %1045 = vmatmul.msk.bf16.gmra.mxu1 %vm511_vm1, %v468_v10 }
 0x139   :  { %v1216_v33 = vpop.eup %1215  ;;  %v685_v35 = vmul.f32 1.442695, %v651_v32 }
 0x13a   :  { %v746_v34 = vadd.f32 1.0, %v1216_v33  ;;  %v1561_v40 = vpop.eup %1217 }
 0x13c   :  { %1219 = vrcp.f32 %v746_v34  ;;  %v576_v36 = vpop.f32.mrf.mxu1 }
 0x13d   :  { %v577_v37 = vadd.f32 %v1550_v16, %v576_v36  ;;  %1221 = vpow2.f32 %v685_v35 }
 0x13f   :  { %v652_v38 = vsub.f32 0.0, %v577_v37 }
 0x140   :  { %v619_v39 = vpop.f32.mrf.mxu2 }
 0x141   :  { %v687_v41 = vmul.f32 1.442695, %v652_v38  ;;  %v620_v42 = vadd.f32 %v1550_v16, %v619_v39 }
 0x142   :  { %v1564_v43 = vpop.eup %1219 }
 0x143   :  { %1223 = vpow2.f32 %v687_v41  ;;  %v669_v4 = vsub.f32 0.0, %v620_v42  ;;  %v810_v8 = vpack.c.bf16 %v1564_v43, %v1561_v40  ;;  %v1222_v10 = vpop.eup %1221 }
 0x144   :  { %v579_v44 = vpop.f32.mrf.mxu1  ;;  %v747_v47 = vadd.f32 1.0, %v1222_v10 }
 0x145   :  { %v580_v45 = vadd.f32 %v1550_v16, %v579_v44  ;;  %v721_v46 = vmul.f32 1.442695, %v669_v4 }
 0x147   :  { %v653_v48 = vsub.f32 0.0, %v580_v45  ;;  %1225 = vpow2.f32 %v721_v46 }
 0x148   :  { %v621_v49 = vpop.f32.mrf.mxu2  ;;  %1227 = vrcp.f32 %v747_v47 }
 0x149   :  { %v1224_v50 = vpop.eup %1223  ;;  %v622_v51 = vadd.f32 %v1550_v16, %v621_v49  ;;  %v689_v53 = vmul.f32 1.442695, %v653_v48 }
 0x14a   :  { %v748_v52 = vadd.f32 1.0, %v1224_v50 }
 0x14b   :  { %v670_v54 = vsub.f32 0.0, %v622_v51 }
 0x14c   :  { %1229 = vrcp.f32 %v748_v52  ;;  %v581_v55 = vpop.f32.mrf.mxu1 }
 0x14d   :  { %v723_v56 = vmul.f32 1.442695, %v670_v54  ;;  %v582_v57 = vadd.f32 %v1550_v16, %v581_v55  ;;  %1231 = vpow2.f32 %v689_v53  ;;  %v1226_v59 = vpop.eup %1225 }
 0x14e   :  { %v1571_v61 = vpop.eup %1227  ;;  %v765_v1 = vadd.f32 1.0, %v1226_v59 }
 0x14f   :  { %1233 = vpow2.f32 %v723_v56  ;;  %v654_v58 = vsub.f32 0.0, %v582_v57 }
 0x150   :  { %v624_v60 = vpop.f32.mrf.mxu2 }
 0x151   :  { %v691_v62 = vmul.f32 1.442695, %v654_v58  ;;  %v625_v63 = vadd.f32 %v1550_v16, %v624_v60 }
 0x152   :  { %v1574_v0 = vpop.eup %1229 }
 0x153   :  { %1235 = vpow2.f32 %v691_v62  ;;  %v671_v2 = vsub.f32 0.0, %v625_v63  ;;  %v811_v3 = vpack.c.bf16 %v1574_v0, %v1571_v61  ;;  %v1232_v5 = vpop.eup %1231  ;;  %v827_v61 = vstv %s1697_s6 }
 0x154   :  { %v584_v6 = vpop.f32.mrf.mxu1  ;;  %1237 = vrcp.f32 %v765_v1  ;;  %v749_v13 = vadd.f32 1.0, %v1232_v5 }
 0x155   :  { %v1234_v7 = vpop.eup %1233  ;;  %v585_v9 = vadd.f32 %v1550_v16, %v584_v6  ;;  %v725_v12 = vmul.f32 1.442695, %v671_v2 }
 0x156   :  { %v766_v11 = vadd.f32 1.0, %v1234_v7 }
 0x157   :  { %v655_v14 = vsub.f32 0.0, %v585_v9 }
 0x158   :  { %1239 = vrcp.f32 %v766_v11  ;;  %v626_v15 = vpop.f32.mrf.mxu2 }
 0x159   :  { %v1236_v21 = vpop.eup %1235  ;;  %v627_v17 = vadd.f32 %v1550_v16, %v626_v15  ;;  %1241 = vpow2.f32 %v725_v12  ;;  %v693_v19 = vmul.f32 1.442695, %v655_v14 }
 0x15a   :  { %v750_v18 = vadd.f32 1.0, %v1236_v21  ;;  %1243 = vrcp.f32 %v749_v13  ;;  %v1580_v23 = vpop.eup %1237 }
 0x15b   :  { %v672_v20 = vsub.f32 0.0, %v627_v17 }
 0x15c   :  { %1245 = vrcp.f32 %v750_v18  ;;  %v586_v22 = vpop.f32.mrf.mxu1 }
 0x15d   :  { %v727_v24 = vmul.f32 1.442695, %v672_v20  ;;  %v587_v25 = vadd.f32 %v1550_v16, %v586_v22  ;;  %1247 = vpow2.f32 %v693_v19 }
 0x15e   :  { %v1583_v26 = vpop.eup %1239 }
 0x15f   :  { %1249 = vpow2.f32 %v727_v24  ;;  %v656_v27 = vsub.f32 0.0, %v587_v25  ;;  %v820_v28 = vpack.c.bf16 %v1583_v26, %v1580_v23  ;;  %v1242_v29 = vpop.eup %1241  ;;  %v835_v23 = vsel %vm161_vm0, %v811_v3, 0 }
 0x160   :  { %v629_v30 = vpop.f32.mrf.mxu2  ;;  %v1587_v31 = vpop.eup %1243  ;;  %v767_v35 = vadd.f32 1.0, %v1242_v29 }
 0x161   :  { %v695_v32 = vmul.f32 1.442695, %v656_v27  ;;  %v630_v33 = vadd.f32 %v1550_v16, %v629_v30 }
 0x162   :  { %v1590_v34 = vpop.eup %1245 }
 0x163   :  { %1251 = vpow2.f32 %v695_v32  ;;  %v673_v36 = vsub.f32 0.0, %v630_v33  ;;  %v812_v37 = vpack.c.bf16 %v1590_v34, %v1587_v31  ;;  %v1248_v38 = vpop.eup %1247  ;;  %v832_v31 = vsel %vm161_vm0, %v810_v8, 0  ;;  %v809_v34 = vld [vmem:[%s1696_s5] sm:$0x1] }
 0x164   :  { %v589_v39 = vpop.f32.mrf.mxu1  ;;  %1253 = vrcp.f32 %v767_v35  ;;  %v751_v44 = vadd.f32 1.0, %v1248_v38 }
 0x165   :  { %v1250_v41 = vpop.eup %1249  ;;  %v590_v42 = vadd.f32 %v1550_v16, %v589_v39  ;;  %v729_v10 = vmul.f32 1.442695, %v673_v36 }
 0x166   :  { %v768_v4 = vadd.f32 1.0, %v1250_v41 }
 0x167   :  { %v657_v45 = vsub.f32 0.0, %v590_v42 }
 0x168   :  { %1255 = vrcp.f32 %v768_v4  ;;  %v631_v46 = vpop.f32.mrf.mxu2 }
 0x169   :  { %v1252_v47 = vpop.eup %1251  ;;  %v632_v48 = vadd.f32 %v1550_v16, %v631_v46  ;;  %1257 = vpow2.f32 %v729_v10  ;;  %v697_v50 = vmul.f32 1.442695, %v657_v45 }
 0x16a   :  { %v752_v49 = vadd.f32 1.0, %v1252_v47  ;;  %1259 = vrcp.f32 %v751_v44  ;;  %v1596_v53 = vpop.eup %1253 }
 0x16b   :  { %v674_v51 = vsub.f32 0.0, %v632_v48 }
 0x16c   :  { %1261 = vrcp.f32 %v752_v49  ;;  %v591_v52 = vpop.f32.mrf.mxu1 }
 0x16d   :  { %v731_v54 = vmul.f32 1.442695, %v674_v51  ;;  %v592_v55 = vadd.f32 %v1550_v16, %v591_v52  ;;  %1263 = vpow2.f32 %v697_v50 }
 0x16e   :  { %v1599_v56 = vpop.eup %1255 }
 0x16f   :  { %1265 = vpow2.f32 %v731_v54  ;;  %v658_v57 = vsub.f32 0.0, %v592_v55  ;;  %v821_v58 = vpack.c.bf16 %v1599_v56, %v1596_v53  ;;  %v1258_v59 = vpop.eup %1257  ;;  %v862_v53 = vsel %vm161_vm0, %v820_v28, 0 }
 0x170   :  { %v634_v60 = vpop.f32.mrf.mxu2  ;;  %v1603_v62 = vpop.eup %1259  ;;  %v769_v2 = vadd.f32 1.0, %v1258_v59 }
 0x171   :  { %v699_v63 = vmul.f32 1.442695, %v658_v57  ;;  %v635_v45 = vadd.f32 %v1550_v16, %v634_v60 }
 0x172   :  { %v1605_v1 = vpop.eup %1261 }
 0x173   :  { %1267 = vpow2.f32 %v699_v63  ;;  %v813_v5 = vpack.c.bf16 %v1605_v1, %v1603_v62  ;;  %v1264_v6 = vpop.eup %1263  ;;  %v675_v57 = vsub.f32 0.0, %v635_v45  ;;  %v838_v62 = vsel %vm161_vm0, %v812_v37, 0 }
 0x174   :  { %v594_v7 = vpop.f32.mrf.mxu1  ;;  %1269 = vrcp.f32 %v769_v2  ;;  %v753_v12 = vadd.f32 1.0, %v1264_v6  ;;  %v911_v37 = vlaneseq }
 0x175   :  { %v1266_v9 = vpop.eup %1265 }
 0x176   :  { %v770_v11 = vadd.f32 1.0, %v1266_v9  ;;  %vm913_vm3 = vcmp.lt.s32.totalorder %v911_v37, 256 }
 0x178   :  { %1271 = vrcp.f32 %v770_v11  ;;  %v636_v13 = vpop.f32.mrf.mxu2 }
 0x179   :  { %v1268_v14 = vpop.eup %1267  ;;  %1273 = vrcp.f32 %v753_v12  ;;  %v637_v51 = vadd.f32 %v1550_v16, %v636_v13 }
 0x17a   :  { %v754_v15 = vadd.f32 1.0, %v1268_v14  ;;  %v1609_v17 = vpop.eup %1269 }
 0x17b   :  { %v676_v11 = vsub.f32 0.0, %v637_v51 }
 0x17c   :  { %1275 = vrcp.f32 %v754_v15  ;;  %v596_v21 = vpop.f32.mrf.mxu1  ;;  %v733_v15 = vmul.f32 1.442695, %v675_v57 }
 0x17d   :  { %v597_v59 = vadd.f32 %v1550_v16, %v596_v21 }
 0x17e   :  { %v1611_v18 = vpop.eup %1271 }
 0x17f   :  { %v822_v19 = vpack.c.bf16 %v1611_v18, %v1609_v17  ;;  %v1615_v22 = vpop.eup %1273  ;;  %v865_v17 = vsel %vm161_vm0, %v821_v58, 0 }
 0x180   :  { %v639_v20 = vpop.f32.mrf.mxu2 }
 0x181   :  { %v640_v38 = vadd.f32 %v1550_v16, %v639_v20  ;;  %v595_v20 = vadd.f32 %v1550_v16, %v594_v7 }
 0x182   :  { %v1617_v24 = vpop.eup %1275 }
 0x183   :  { %v814_v25 = vpack.c.bf16 %v1617_v24, %v1615_v22  ;;  %v677_v46 = vsub.f32 0.0, %v640_v38  ;;  %v841_v22 = vsel %vm161_vm0, %v813_v5, 0 }
 0x184   :  { %v599_v27 = vpop.f32.mrf.mxu1 }
 0x185   :  { %v600_v48 = vadd.f32 %v1550_v16, %v599_v27  ;;  %v737_v63 = vmul.f32 1.442695, %v677_v46  ;;  %v660_v27 = vsub.f32 0.0, %v597_v59 }
 0x187   :  { %v661_v6 = vsub.f32 0.0, %v600_v48 }
 0x188   :  { %v641_v29 = vpop.f32.mrf.mxu2 }
 0x189   :  { %v642_v33 = vadd.f32 %v1550_v16, %v641_v29  ;;  %v705_v29 = vmul.f32 1.442695, %v661_v6 }
 0x18b   :  { %v678_v41 = vsub.f32 0.0, %v642_v33 }
 0x18c   :  { %v601_v30 = vpop.f32.mrf.mxu1 }
 0x18d   :  { %v602_v4 = vadd.f32 %v1550_v16, %v601_v30  ;;  %v739_v49 = vmul.f32 1.442695, %v678_v41  ;;  %v735_v30 = vmul.f32 1.442695, %v676_v11  ;;  %v703_v41 = vmul.f32 1.442695, %v660_v27 }
 0x18f   :  { %v662_v52 = vsub.f32 0.0, %v602_v4 }
 0x190   :  { %v644_v32 = vpop.f32.mrf.mxu2 }
 0x191   :  { %v645_v35 = vadd.f32 %v1550_v16, %v644_v32  ;;  %v707_v12 = vmul.f32 1.442695, %v662_v52 }
 0x193   :  { %v679_v36 = vsub.f32 0.0, %v645_v35 }
 0x194   :  { %v604_v39 = vpop.f32.mrf.mxu1 }
 0x195   :  { %v605_v42 = vadd.f32 %v1550_v16, %v604_v39  ;;  %v741_v10 = vmul.f32 1.442695, %v679_v36  ;;  %v659_v39 = vsub.f32 0.0, %v595_v20 }
 0x197   :  { %v663_v44 = vsub.f32 0.0, %v605_v42  ;;  %1277 = vpow2.f32 %v741_v10  ;;  %v701_v46 = vmul.f32 1.442695, %v659_v39 }
 0x198   :  { %v646_v47 = vpop.f32.mrf.mxu2  ;;  %1279 = vpow2.f32 %v739_v49 }
 0x199   :  { %v647_v50 = vadd.f32 %v1550_v16, %v646_v47  ;;  %v709_v54 = vmul.f32 1.442695, %v663_v44 }
 0x19b   :  { %v680_v55 = vsub.f32 0.0, %v647_v50  ;;  %1281 = vpow2.f32 %v709_v54 }
 0x19c   :  { %v606_v2 = vpop.f32.mrf.mxu1 }
 0x19d   :  { %v743_v60 = vmul.f32 1.442695, %v680_v55  ;;  %v607_v9 = vadd.f32 %v1550_v16, %v606_v2  ;;  %v1278_v13 = vpop.eup %1277 }
 0x19e   :  { %v1280_v32 = vpop.eup %1279  ;;  %v775_v33 = vadd.f32 1.0, %v1278_v13 }
 0x19f   :  { %1283 = vpow2.f32 %v743_v60  ;;  %v664_v14 = vsub.f32 0.0, %v607_v9  ;;  %v774_v42 = vadd.f32 1.0, %v1280_v32 }
 0x1a0   :  { %1285 = vpow2.f32 %v737_v63 }
 0x1a1   :  { %v711_v21 = vmul.f32 1.442695, %v664_v14  ;;  %1287 = vpow2.f32 %v707_v12  ;;  %v1282_v35 = vpop.eup %1281 }
 0x1a2   :  { %v759_v10 = vadd.f32 1.0, %v1282_v35 }
 0x1a3   :  { %1289 = vpow2.f32 %v711_v21 }
 0x1a4   :  { %1291 = vpow2.f32 %v733_v15  ;;  %v1633_v36 = vpop.f32.mrf.mxu1 }
 0x1a5   :  { %v1284_v38 = vpop.eup %1283  ;;  %1293 = vpow2.f32 %v705_v29 }
 0x1a6   :  { %1295 = vpow2.f32 %v735_v30  ;;  %v776_v7 = vadd.f32 1.0, %v1284_v38  ;;  %v1286_v4 = vpop.eup %1285 }
 0x1a7   :  { %1297 = vrcp.f32 %v775_v33  ;;  %v1288_v44 = vpop.eup %1287  ;;  %v773_v48 = vadd.f32 1.0, %v1286_v4 }
 0x1a8   :  { %1299 = vrcp.f32 %v776_v7  ;;  %v758_v52 = vadd.f32 1.0, %v1288_v44 }
 0x1a9   :  { %v1290_v45 = vpop.eup %1289  ;;  %1301 = vpow2.f32 %v703_v41 }
 0x1aa   :  { %v1292_v47 = vpop.eup %1291  ;;  %1303 = vrcp.f32 %v774_v42  ;;  %v760_v49 = vadd.f32 1.0, %v1290_v45 }
 0x1ab   :  { %v1294_v50 = vpop.eup %1293  ;;  %1305 = vrcp.f32 %v759_v10  ;;  %v771_v14 = vadd.f32 1.0, %v1292_v47 }
 0x1ac   :  { %v1296_v51 = vpop.eup %1295  ;;  %1307 = vrcp.f32 %v760_v49  ;;  %v611_v54 = vpop.f32.mrf.mxu1  ;;  %v757_v59 = vadd.f32 1.0, %v1294_v50 }
 0x1ad   :  { %v1298_v55 = vpop.eup %1297  ;;  %1309 = vpow2.f32 %v701_v46  ;;  %v772_v60 = vadd.f32 1.0, %v1296_v51 }
 0x1ae   :  { %v1300_v57 = vpop.eup %1299  ;;  %1311 = vrcp.f32 %v773_v48 }
 0x1af   :  { %v1302_v63 = vpop.eup %1301  ;;  %v825_v2 = vpack.c.bf16 %v1300_v57, %v1298_v55  ;;  %1313 = vrcp.f32 %v758_v52  ;;  %v610_v52 = vadd.f32 %v1550_v16, %v1633_v36  ;;  %v612_v55 = vadd.f32 %v1550_v16, %v611_v54 }
 0x1b0   :  { %v1304_v6 = vpop.eup %1303  ;;  %1315 = vrcp.f32 %v757_v59  ;;  %v756_v27 = vadd.f32 1.0, %v1302_v63 }
 0x1b1   :  { %v1306_v9 = vpop.eup %1305  ;;  %v877_v11 = vsel %vm161_vm0, %v825_v2, 0  ;;  %1317 = vrcp.f32 %v772_v60  ;;  %v665_v2 = vsub.f32 0.0, %v610_v52  ;;  %v868_v60 = vsel %vm161_vm0, %v822_v19, 0 }
 0x1b2   :  { %v1308_v12 = vpop.eup %1307  ;;  %892 = vmatpush.bf16.xpose.msrb.mxu3 %v877_v11  ;;  %1319 = vrcp.f32 %v771_v14 }
 0x1b3   :  { %v1310_v13 = vpop.eup %1309  ;;  %v817_v15 = vpack.c.bf16 %v1308_v12, %v1306_v9  ;;  %1321 = vrcp.f32 %v756_v27  ;;  %v713_v9 = vmul.f32 1.442695, %v665_v2 }
 0x1b4   :  { %v1312_v20 = vpop.eup %1311  ;;  %v614_v29 = vpop.f32.mrf.mxu1  ;;  %v755_v33 = vadd.f32 1.0, %v1310_v13 }
 0x1b5   :  { %v853_v21 = vsel %vm161_vm0, %v817_v15, 0  ;;  %v824_v30 = vpack.c.bf16 %v1304_v6, %v1312_v20  ;;  %v1314_v32 = vpop.eup %1313  ;;  %v615_v4 = vadd.f32 %v1550_v16, %v614_v29  ;;  %v666_v6 = vsub.f32 0.0, %v612_v55 }
 0x1b6   :  { %879 = vmatpush.bf16.xpose.msrb.mxu2 %v853_v21  ;;  %v1316_v35 = vpop.eup %1315  ;;  %1323 = vrcp.f32 %v755_v33 }
 0x1b7   :  { %v874_v38 = vsel %vm161_vm0, %v824_v30, 0  ;;  %v816_v39 = vpack.c.bf16 %v1314_v32, %v1316_v35  ;;  %v1318_v41 = vpop.eup %1317  ;;  %v667_v49 = vsub.f32 0.0, %v615_v4  ;;  %v715_v36 = vmul.f32 1.442695, %v666_v6 }
 0x1b8   :  { %v1320_v42 = vpop.eup %1319 }
 0x1b9   :  { %v850_v44 = vsel %vm161_vm0, %v816_v39, 0  ;;  %v823_v45 = vpack.c.bf16 %v1318_v41, %v1320_v42  ;;  %v1322_v46 = vpop.eup %1321  ;;  %v717_v59 = vmul.f32 1.442695, %v667_v49 }
 0x1ba   :  { %893 = vmatpush.bf16.xpose.msrb.mxu3 %v874_v38 }
 0x1bb   :  { %v871_v50 = vsel %vm161_vm0, %v823_v45, 0 }
 0x1bc   :  { %v616_v7 = vpop.f32.mrf.mxu1  ;;  %v1324_v48 = vpop.eup %1323 }
 0x1bd   :  { %v617_v10 = vadd.f32 %v1550_v16, %v616_v7  ;;  %v815_v51 = vpack.c.bf16 %v1322_v46, %v1324_v48  ;;  %v844_v16 = vsel %vm161_vm0, %v814_v25, 0 }
 0x1be   :  { %880 = vmatpush.bf16.xpose.msrb.mxu2 %v850_v44 }
 0x1bf   :  { %v668_v47 = vsub.f32 0.0, %v617_v10  ;;  %v847_v63 = vsel %vm161_vm0, %v815_v51, 0 }
 0x1c1   :  { %v719_v57 = vmul.f32 1.442695, %v668_v47 }
 0x1c2   :  { %894 = vmatpush.bf16.xpose.msrb.mxu3 %v871_v50 }
 0x1c3   :  { %1325 = vpow2.f32 %v719_v57 }
 0x1c4   :  { %1327 = vpow2.f32 %v717_v59 }
 0x1c5   :  { %1329 = vpow2.f32 %v713_v9 }
 0x1c6   :  { %881 = vmatpush.bf16.xpose.msrb.mxu2 %v847_v63  ;;  %1331 = vpow2.f32 %v715_v36 }
 0x1c9   :  { %v1326_v11 = vpop.eup %1325 }
 0x1ca   :  { %895 = vmatpush.bf16.xpose.msrb.mxu3 %v868_v60  ;;  %v1328_v54 = vpop.eup %1327  ;;  %v764_v12 = vadd.f32 1.0, %v1326_v11 }
 0x1cb   :  { %v763_v18 = vadd.f32 1.0, %v1328_v54  ;;  %v1330_v19 = vpop.eup %1329 }
 0x1cc   :  { %1333 = vrcp.f32 %v764_v12  ;;  %v1332_v14 = vpop.eup %1331  ;;  %v761_v24 = vadd.f32 1.0, %v1330_v19 }
 0x1cd   :  { %1335 = vrcp.f32 %v763_v18  ;;  %v762_v25 = vadd.f32 1.0, %v1332_v14 }
 0x1ce   :  { %882 = vmatpush.bf16.xpose.msrb.mxu2 %v844_v16  ;;  %1337 = vrcp.f32 %v761_v24 }
 0x1cf   :  { %1339 = vrcp.f32 %v762_v25 }
 0x1d2   :  { %896 = vmatpush.bf16.xpose.msrb.mxu3 %v865_v17  ;;  %v1334_v56 = vpop.eup %1333 }
 0x1d3   :  { %v1336_v58 = vpop.eup %1335 }
 0x1d4   :  { %v819_v1 = vpack.c.bf16 %v1334_v56, %v1336_v58  ;;  %v1338_v5 = vpop.eup %1337 }
 0x1d5   :  { %v1340_v15 = vpop.eup %1339 }
 0x1d6   :  { %883 = vmatpush.bf16.xpose.msrb.mxu2 %v841_v22  ;;  %v859_v13 = vsel %vm161_vm0, %v819_v1, 0  ;;  %v818_v26 = vpack.c.bf16 %v1340_v15, %v1338_v5 }
 0x1d8   :  { %v856_v28 = vsel %vm161_vm0, %v818_v26, 0 }
 0x1da   :  { %897 = vmatpush.bf16.xpose.msrb.mxu3 %v862_v53 }
 0x1de   :  { %884 = vmatpush.bf16.xpose.msrb.mxu2 %v838_v62 }
 0x1e2   :  { %898 = vmatpush.bf16.xpose.msrb.mxu3 %v859_v13 }
 0x1e6   :  { %885 = vmatpush.bf16.xpose.msrb.mxu2 %v835_v23 }
 0x1ea   :  { %899 = vmatpush.bf16.xpose.msrb.mxu3 %v856_v28 }
 0x1ee   :  { %886 = vmatpush.bf16.xpose.msrb.mxu2 %v832_v31 }
 0x1f1   :  { %1053 = vmatmul.msk.bf16.vlgmr.msrb.gmra.mxu3 %vm161_vm0, %v809_v34 }
 0x1f5   :  { %1052 = vmatmul.msk.bf16.vlgmr.msrb.gmra.mxu2 %vm161_vm0, %v809_v34 }
 0x274   :  { %v901_v0 = vpop.f32.mrf.mxu3 }
 0x275   :  { %v902_v3 = vadd.f32 %v901_v0, %v827_v61 }
 0x277   :  { %v907_v20 = vrot.slane %v902_v3, 7 }
 0x278   :  { %v888_v40 = vpop.f32.mrf.mxu2 }
 0x279   :  { %v889_v43 = vadd.f32 %v888_v40, %v827_v61 }
 0x27b   :  { %v909_v8 = vsel %vm908_vm2, %v889_v43, %v907_v20 }
 0x27c   :  { %v903_v27 = vpop.f32.mrf.mxu3  ;;  %915 = vst.msk [vmem:[#allocation3] sm:$0x3] %vm913_vm3, %v909_v8 }
 0x27d   :  { %926 = dma.vmem_to_hbm [thread:$0]  %s922_s25, 32, %s924_s28, [#allocation4]  }
 0x280   :  { %v890_v29 = vpop.f32.mrf.mxu2 }
 0x281   :  { %1365 = dma.done.wait [#allocation4], 32  }
 0x282   :  { %1366 = vsyncadd [#allocation4], 4294967264 }
 0x283   :  { %931 = vsyncpa [#allocation4], 1 }

</bundles_post_ra>
